<compile_context>
chip_gen: v5e
topology: v5e:2x2
jax: 0.10.0
libtpu: 0.0.40
codegen_flags: <defaults>
</compile_context>

<pallas_src>
import jax
import jax.numpy as jnp
from jax.experimental import pallas as pl
from jax.experimental.pallas import tpu as pltpu


def _mean_act_kernel(x_ref, o_ref):
    # Elementwise hot path: exp on the EUP, clip on the VPU. Compute in f32.
    x = x_ref[...].astype(jnp.float32)
    y = jnp.clip(jnp.exp(x), 1e-05, 1e06)
    o_ref[...] = y.astype(o_ref.dtype)


def mean_act(x, *, target_block_bytes=2 * 1024 * 1024):
    """MeanAct forward: clamp(exp(x), 1e-5, 1e6). Works for any-rank input."""
    orig_shape = x.shape
    orig_dtype = x.dtype

    n = x.size
    if n == 0:
        return x

    itemsize = jnp.dtype(orig_dtype).itemsize
    # Minimum sublane tile per dtype: 8 (f32) / 16 (bf16) / 32 (int8, fp8).
    sublane = max(8, 32 // max(itemsize, 1))
    lane = 128

    # Flatten to 1-D (free bitcast for row-major layouts).
    flat = x.reshape(-1)

    # Pad only when the flat size is not a multiple of 128 (rare edge case;
    # exp(0)=1 in the padded tail is dropped by the final slice).
    pad = (-n) % lane
    if pad:
        flat = jnp.pad(flat, (0, pad))
    npad = n + pad

    # Lane-dense cols: largest "nice" multiple of 128 that divides the size.
    cols = lane
    for c in (8192, 4096, 2048, 1024, 512, 256, 128):
        if npad % c == 0:
            cols = c
            break
    rows = npad // cols
    x2 = flat.reshape(rows, cols)

    # Row tile: ~target_block_bytes per block, rounded to the sublane multiple.
    tm = (target_block_bytes // (cols * itemsize)) // sublane * sublane
    tm = max(sublane, tm)
    if tm >= rows:
        tm = rows  # block == full dim is always a legal tiling

    grid = (pl.cdiv(rows, tm),)  # ragged last block is masked by Pallas

    out = pl.pallas_call(
        _mean_act_kernel,
        out_shape=jax.ShapeDtypeStruct((rows, cols), orig_dtype),
        grid=grid,
        in_specs=[pl.BlockSpec((tm, cols), lambda i: (i, 0))],
        out_specs=pl.BlockSpec((tm, cols), lambda i: (i, 0)),
        compiler_params=pltpu.CompilerParams(
            dimension_semantics=("parallel",)
        ),
    )(x2)

    out_flat = out.reshape(-1)
    if pad:
        out_flat = out_flat[:n]
    return out_flat.reshape(orig_shape)


if __name__ == "__main__":
    key = jax.random.PRNGKey(0)
    k1, k2 = jax.random.split(key)

    # Small shape consistent with the module's usage (batch of dense features).
    x = jax.random.normal(k1, (2, 32), dtype=jnp.float32) * 5.0  # spread values
    y = jax.block_until_ready(mean_act(x))
    y_ref = jnp.clip(jnp.exp(x), 1e-05, 1e06)
    assert y.shape == x.shape and y.dtype == x.dtype
    assert jnp.allclose(y, y_ref, rtol=1e-6, atol=1e-6), "mismatch vs reference"

    # Second small case exercising the no-pad, lane-dense path (size % 128 == 0).
    x2 = jax.random.normal(k2, (3, 384), dtype=jnp.float32) * 5.0
    y2 = jax.block_until_ready(mean_act(x2))
    y2_ref = jnp.clip(jnp.exp(x2), 1e-05, 1e06)
    assert y2.shape == x2.shape and y2.dtype == x2.dtype
    assert jnp.allclose(y2, y2_ref, rtol=1e-6, atol=1e-6), "mismatch vs reference"

    print("KERNEL_OK")
</pallas_src>

<mosaic_0001>
module attributes {stable_mosaic.version = 11 : i64} {
  func.func @_mean_act_kernel(%arg0: i32, %arg1: memref<1x128xf32, #tpu.memory_space<vmem>>, %arg2: memref<1x128xf32, #tpu.memory_space<vmem>>) attributes {dimension_semantics = [#tpu.dimension_semantics<parallel>], iteration_bounds = array<i64: 1>, scalar_prefetch = 0 : i64, scratch_operands = 0 : i64, tpu.core_type = #tpu.core_type<tc>, window_params = [{transform_indices = @transform_0, window_bounds = array<i64: 1, 128>}, {transform_indices = @transform_1, window_bounds = array<i64: 1, 128>}]} {
    %c0 = arith.constant 0 : index
    %c0_0 = arith.constant 0 : index
    %0 = vector.load %arg1[%c0, %c0_0] : memref<1x128xf32, #tpu.memory_space<vmem>>, vector<1x128xf32>
    %1 = math.exp %0 : vector<1x128xf32>
    %cst = arith.constant 9.99999974E-6 : f32
    %cst_1 = arith.constant 1.000000e+06 : f32
    %2 = vector.broadcast %cst : f32 to vector<1x128xf32>
    %3 = arith.maximumf %2, %1 : vector<1x128xf32>
    %4 = vector.broadcast %cst_1 : f32 to vector<1x128xf32>
    %5 = arith.minimumf %4, %3 : vector<1x128xf32>
    %c0_2 = arith.constant 0 : index
    %c0_3 = arith.constant 0 : index
    %6 = vector.load %arg2[%c0_2, %c0_3] : memref<1x128xf32, #tpu.memory_space<vmem>>, vector<1x128xf32>
    tpu.vector_store %arg2[%c0_2, %c0_3], %5 {strides = array<i32>} : memref<1x128xf32, #tpu.memory_space<vmem>>, vector<1x128xf32>,
    return
  }
  func.func @transform_0(%arg0: i32) -> (i32, i32) {
    %c0_i32 = arith.constant 0 : i32
    %c0_i32_0 = arith.constant 0 : i32
    return %arg0, %c0_i32 : i32, i32
  }
  func.func @transform_1(%arg0: i32) -> (i32, i32) {
    %c0_i32 = arith.constant 0 : i32
    %c0_i32_0 = arith.constant 0 : i32
    return %arg0, %c0_i32 : i32, i32
  }
}

</mosaic_0001>

<bundles_post_ra>
// kernel: tpu_custom_call.1
= control target key start
LH: loop header
LB: loop body
LE: loop exit
PB: predicated region body
PF: predicated region fallthrough
CT: control target
= control target key end

     0   :  { %6 = vsyncpa [#allocation3], 0  ;;  %s120_s0 = inlined_call_operand.hbm [shape: f32[1,128], index: 0, kind: input, shape index: {}]   ;;  %s121_s1 = inlined_call_operand.hbm [shape: f32[1,128], index: 1, kind: output, shape index: {}]  }
   0x1   :  { %7 = vsyncpa [#allocation4], 0  ;;  %s13_s8 = sshll.u32 %s120_s0, 4  ;;  %s102_s9 = smov [#allocation2]   ;;  %s14_s8 = int_to_ptr.hbm [resolvable:$true] %s13_s8 }
   0x2   :  { %s15_s10 = sshll.u32 %s102_s9, 4  ;;  %s16_s10 = int_to_ptr.vmem [resolvable:$true] %s15_s10 }
   0x3   :  { %18 = dma.hbm_to_vmem [thread:$0]  %s14_s8, 16, %s16_s10, [#allocation3]  }
   0x4   :  { %98 = dma.done.wait [#allocation3], 16  }
   0x5   :  { %99 = vsyncadd [#allocation3], 4294967280  ;;  %v23_v0 = vld [vmem:[#allocation2] sm:$0x1]  ;;  %s103_s11 = smov [#allocation5]   ;;  %s36_s15 = sshll.u32 %s121_s1, 4  ;;  %s37_s15 = int_to_ptr.hbm [resolvable:$true] %s36_s15 }
   0x6   :  { %v24_v1 = vmul.f32 1.442695, %v23_v0  ;;  %s34_s12 = sshll.u32 %s103_s11, 4  ;;  %s35_s12 = int_to_ptr.vmem [resolvable:$true] %s34_s12 }
   0x8   :  { %48 = vpow2.f32 %v24_v1 }
   0xe   :  { %v49_v2 = vpop.eup %48 }
   0xf   :  { %v26_v3 = vmax.f32 %v49_v2, 1e-05 }
  0x11   :  { %v27_v4 = vmin.f32 %v26_v3, 1000000.0 }
  0x13   :  { %28 = vst [vmem:[#allocation5] sm:$0x1] %v27_v4 }
  0x14   :  { %39 = dma.vmem_to_hbm [thread:$0]  %s35_s12, 16, %s37_s15, [#allocation4]  }
  0x15   :  { %100 = dma.done.wait [#allocation4], 16  }
  0x16   :  { %101 = vsyncadd [#allocation4], 4294967280 }
  0x17   :  { %44 = vsyncpa [#allocation3], 1 }
  0x18   :  { %45 = vsyncpa [#allocation4], 1 }

</bundles_post_ra>
